<compile_context>
chip_gen: v7x
topology: tpu7x:2x2x1
jax: 0.10.0
libtpu: 0.0.40
codegen_flags: <defaults>
</compile_context>

<pallas_src>
import jax
import jax.numpy as jnp
from jax import lax
from jax.experimental import pallas as pl
from jax.experimental.pallas import tpu as pltpu


def _round_up(n: int, m: int) -> int:
    return ((n + m - 1) // m) * m


def rnn_fused_kernel(x_ref, wih_ref, bias_ref, whh_ref, h_ref, xp_ref):
    """Fused input-projection + RNN recurrence, single invocation.

    x_ref   : (S*Bp, I)   time-major, batch-padded input (row t*Bp+b = x[b, t, :])
    wih_ref : (I, Hp)     W_ih^T, zero-padded columns
    bias_ref: (1, Hp)     b_ih + b_hh, zero in padded lanes
    whh_ref : (Hp, Hp)    W_hh^T, zero-padded rows/cols
    h_ref   : (Bp, Hp)    output — final hidden state h_S (lane-dense)
    xp_ref  : (S*Bp, Hp)  VMEM scratch holding the hoisted projection for all timesteps

    Padding invariant: zero-padded W_ih columns, zero bias lanes and zero-padded W_hh
    rows/cols keep padded hidden lanes at tanh(0) == 0 for every step, so padding never
    feeds back into real lanes.
    """
    bp = h_ref.shape[0]
    hp = h_ref.shape[1]
    seq_len = x_ref.shape[0] // bp

    # ---- Fused input projection for ALL timesteps: one MXU pass (f32). ----
    xp_ref[...] = (
        jnp.dot(x_ref[...], wih_ref[...], preferred_element_type=jnp.float32)
        + bias_ref[...]
    )

    # ---- Recurrent weight: load + bf16-cast once, keep it loop-invariant. ----
    # Guarded hoist: at Hp=128 this is 8 bf16 vregs; above ~256 it would spill, so let the
    # dot read W_hh from VMEM per step instead.
    hoist_whh = hp <= 256
    whh_hoisted = whh_ref[...].astype(jnp.bfloat16) if hoist_whh else None

    def step(t, h):
        start = pl.multiple_of(t * bp, bp)            # aligned sublane slice of xp
        xp_t = xp_ref[pl.ds(start, bp), :]
        whh = whh_hoisted if hoist_whh else whh_ref[...].astype(jnp.bfloat16)
        # bf16 MXU inputs, f32 accumulation; xp add + tanh in f32.
        hw = jnp.dot(h.astype(jnp.bfloat16), whh, preferred_element_type=jnp.float32)
        return jnp.tanh(xp_t + hw)

    h0 = jnp.zeros((bp, hp), jnp.float32)              # h0 = zeros (PyTorch default)
    h_ref[...] = lax.fori_loop(0, seq_len, step, h0, unroll=min(seq_len, 8))


def rnn_model_forward(x, params):
    """x: (batch, seq, input_size) float32 — same semantics as RNNModel.forward."""
    B, S, I = x.shape
    H = params["w_hh"].shape[0]

    Bp = _round_up(B, 8)      # f32 sublane
    Hp = _round_up(H, 128)    # lane

    # Pad the batch on the raw input (cheap: (Bp-B)*S*I), not on the projected xp.
    x_p = x.astype(jnp.float32)
    if Bp != B:
        x_p = jnp.pad(x_p, ((0, Bp - B), (0, 0), (0, 0)))
    # Time-major, flattened so the in-kernel projection is one (S*Bp, I) x (I, Hp) dot.
    x_tm = jnp.transpose(x_p, (1, 0, 2)).reshape(S * Bp, I)

    # Zero-padded weights / bias (preserve the padded-lane == 0 invariant).
    w_ih_t = jnp.zeros((I, Hp), jnp.float32).at[:, :H].set(params["w_ih"].T)
    bias = jnp.zeros((1, Hp), jnp.float32).at[0, :H].set(params["b_ih"] + params["b_hh"])
    w_hh_t = jnp.zeros((Hp, Hp), jnp.float32).at[:H, :H].set(params["w_hh"].T)

    # VMEM footprint at example shapes: x 4 KiB, W_ih 8 KiB, W_hh 64 KiB, xp scratch 32 KiB.
    h_last = pl.pallas_call(
        rnn_fused_kernel,
        out_shape=jax.ShapeDtypeStruct((Bp, Hp), jnp.float32),
        in_specs=[
            pl.BlockSpec(memory_space=pltpu.MemorySpace.VMEM),   # x (time-major, padded)
            pl.BlockSpec(memory_space=pltpu.MemorySpace.VMEM),   # W_ih^T
            pl.BlockSpec(memory_space=pltpu.MemorySpace.VMEM),   # bias
            pl.BlockSpec(memory_space=pltpu.MemorySpace.VMEM),   # W_hh^T
        ],
        out_specs=pl.BlockSpec(memory_space=pltpu.MemorySpace.VMEM),
        scratch_shapes=[pltpu.VMEM((S * Bp, Hp), jnp.float32)],
    )(x_tm, w_ih_t, bias, w_hh_t)

    h_last = h_last[:B, :H]                                      # drop padding
    # Tiny FC head (O=4): keep in XLA — avoids a masked partial store in-kernel.
    return h_last @ params["w_fc"].T + params["b_fc"]


def rnn_model_reference(x, params):
    """Pure-JAX f32 reference matching PyTorch nn.RNN + nn.Linear semantics."""
    B, S, I = x.shape
    H = params["w_hh"].shape[0]
    h = jnp.zeros((B, H), jnp.float32)
    for t in range(S):
        h = jnp.tanh(x[:, t, :] @ params["w_ih"].T + params["b_ih"]
                     + h @ params["w_hh"].T + params["b_hh"])
    return h @ params["w_fc"].T + params["b_fc"]


if __name__ == "__main__":
    # Small shapes consistent with RNNModel(input_size, hidden_size, output_size)
    B, S, I, H, O = 2, 8, 16, 32, 4

    key = jax.random.PRNGKey(0)
    ks = jax.random.split(key, 7)
    scale = 1.0 / jnp.sqrt(jnp.float32(H))
    params = {
        # PyTorch nn.RNN weight shapes: weight_ih_l0 (H, I), weight_hh_l0 (H, H)
        "w_ih": jax.random.uniform(ks[0], (H, I), jnp.float32, -scale, scale),
        "w_hh": jax.random.uniform(ks[1], (H, H), jnp.float32, -scale, scale),
        "b_ih": jax.random.uniform(ks[2], (H,), jnp.float32, -scale, scale),
        "b_hh": jax.random.uniform(ks[3], (H,), jnp.float32, -scale, scale),
        # nn.Linear(hidden, output): weight (O, H), bias (O,)
        "w_fc": jax.random.uniform(ks[4], (O, H), jnp.float32, -scale, scale),
        "b_fc": jax.random.uniform(ks[5], (O,), jnp.float32, -scale, scale),
    }
    x = jax.random.normal(ks[6], (B, S, I), jnp.float32)

    out = jax.block_until_ready(rnn_model_forward(x, params))
    ref = rnn_model_reference(x, params)

    assert out.shape == (B, O), out.shape
    # Tolerance loosened (bf16 MXU inputs on the recurrent dot, f32 accumulation).
    assert jnp.allclose(out, ref, atol=2e-2, rtol=2e-2), (out, ref)
    print("KERNEL_OK")
</pallas_src>

<mosaic_0001>
module attributes {stable_mosaic.version = 11 : i64} {
  func.func @rnn_fused_kernel(%arg0: memref<64x16xf32, #tpu.memory_space<vmem>>, %arg1: memref<16x128xf32, #tpu.memory_space<vmem>>, %arg2: memref<1x128xf32, #tpu.memory_space<vmem>>, %arg3: memref<128x128xf32, #tpu.memory_space<vmem>>, %arg4: memref<8x128xf32, #tpu.memory_space<vmem>>, %arg5: memref<64x128xf32, #tpu.memory_space<vmem>>) attributes {dimension_semantics = [], scalar_prefetch = 0 : i64, scratch_operands = 1 : i64, tpu.core_type = #tpu.core_type<tc>} {
    %c0 = arith.constant 0 : index
    %c0_0 = arith.constant 0 : index
    %0 = vector.load %arg0[%c0, %c0_0] : memref<64x16xf32, #tpu.memory_space<vmem>>, vector<64x16xf32>
    %c0_1 = arith.constant 0 : index
    %c0_2 = arith.constant 0 : index
    %1 = vector.load %arg1[%c0_1, %c0_2] : memref<16x128xf32, #tpu.memory_space<vmem>>, vector<16x128xf32>
    %cst = arith.constant dense<0.000000e+00> : vector<64x128xf32>
    %2 = tpu.matmul %0, %1, %cst {dimension_numbers = #tpu.dot_dimension_numbers<[1], [0], [0], [1], [0, 0, 1, 1], [], []>} : vector<64x16xf32>, vector<16x128xf32>, vector<64x128xf32> -> vector<64x128xf32>
    %c0_3 = arith.constant 0 : index
    %c0_4 = arith.constant 0 : index
    %3 = vector.load %arg2[%c0_3, %c0_4] : memref<1x128xf32, #tpu.memory_space<vmem>>, vector<1x128xf32>
    %4 = vector.broadcast %3 : vector<1x128xf32> to vector<64x128xf32>
    %5 = arith.addf %2, %4 : vector<64x128xf32>
    %c0_5 = arith.constant 0 : index
    %c0_6 = arith.constant 0 : index
    %6 = vector.load %arg5[%c0_5, %c0_6] : memref<64x128xf32, #tpu.memory_space<vmem>>, vector<64x128xf32>
    tpu.vector_store %arg5[%c0_5, %c0_6], %5 {strides = array<i32>} : memref<64x128xf32, #tpu.memory_space<vmem>>, vector<64x128xf32>,
    %c0_7 = arith.constant 0 : index
    %c0_8 = arith.constant 0 : index
    %7 = vector.load %arg3[%c0_7, %c0_8] : memref<128x128xf32, #tpu.memory_space<vmem>>, vector<128x128xf32>
    %8 = arith.truncf %7 : vector<128x128xf32> to vector<128x128xbf16>
    %cst_9 = arith.constant 0.000000e+00 : f32
    %9 = vector.broadcast %cst_9 : f32 to vector<8x128xf32>
    %c0_i32 = arith.constant 0 : i32
    %c8_i32 = arith.constant 8 : i32
    %10 = arith.muli %c0_i32, %c8_i32 : i32
    %11 = tpu.assume_multiple %10, 8 : i32
    %12 = arith.index_cast %11 : i32 to index
    %c0_10 = arith.constant 0 : index
    %13 = vector.load %arg5[%12, %c0_10] : memref<64x128xf32, #tpu.memory_space<vmem>>, vector<8x128xf32>
    %14 = arith.truncf %9 : vector<8x128xf32> to vector<8x128xbf16>
    %cst_11 = arith.constant dense<0.000000e+00> : vector<8x128xf32>
    %15 = tpu.matmul %14, %8, %cst_11 {dimension_numbers = #tpu.dot_dimension_numbers<[1], [0], [0], [1], [0, 0, 1, 1], [], []>} : vector<8x128xbf16>, vector<128x128xbf16>, vector<8x128xf32> -> vector<8x128xf32>
    %16 = arith.addf %13, %15 : vector<8x128xf32>
    %17 = math.tanh %16 : vector<8x128xf32>
    %c1_i32 = arith.constant 1 : i32
    %c8_i32_12 = arith.constant 8 : i32
    %18 = arith.muli %c1_i32, %c8_i32_12 : i32
    %19 = tpu.assume_multiple %18, 8 : i32
    %20 = arith.index_cast %19 : i32 to index
    %c0_13 = arith.constant 0 : index
    %21 = vector.load %arg5[%20, %c0_13] : memref<64x128xf32, #tpu.memory_space<vmem>>, vector<8x128xf32>
    %22 = arith.truncf %17 : vector<8x128xf32> to vector<8x128xbf16>
    %cst_14 = arith.constant dense<0.000000e+00> : vector<8x128xf32>
    %23 = tpu.matmul %22, %8, %cst_14 {dimension_numbers = #tpu.dot_dimension_numbers<[1], [0], [0], [1], [0, 0, 1, 1], [], []>} : vector<8x128xbf16>, vector<128x128xbf16>, vector<8x128xf32> -> vector<8x128xf32>
    %24 = arith.addf %21, %23 : vector<8x128xf32>
    %25 = math.tanh %24 : vector<8x128xf32>
    %c2_i32 = arith.constant 2 : i32
    %c8_i32_15 = arith.constant 8 : i32
    %26 = arith.muli %c2_i32, %c8_i32_15 : i32
    %27 = tpu.assume_multiple %26, 8 : i32
    %28 = arith.index_cast %27 : i32 to index
    %c0_16 = arith.constant 0 : index
    %29 = vector.load %arg5[%28, %c0_16] : memref<64x128xf32, #tpu.memory_space<vmem>>, vector<8x128xf32>
    %30 = arith.truncf %25 : vector<8x128xf32> to vector<8x128xbf16>
    %cst_17 = arith.constant dense<0.000000e+00> : vector<8x128xf32>
    %31 = tpu.matmul %30, %8, %cst_17 {dimension_numbers = #tpu.dot_dimension_numbers<[1], [0], [0], [1], [0, 0, 1, 1], [], []>} : vector<8x128xbf16>, vector<128x128xbf16>, vector<8x128xf32> -> vector<8x128xf32>
    %32 = arith.addf %29, %31 : vector<8x128xf32>
    %33 = math.tanh %32 : vector<8x128xf32>
    %c3_i32 = arith.constant 3 : i32
    %c8_i32_18 = arith.constant 8 : i32
    %34 = arith.muli %c3_i32, %c8_i32_18 : i32
    %35 = tpu.assume_multiple %34, 8 : i32
    %36 = arith.index_cast %35 : i32 to index
    %c0_19 = arith.constant 0 : index
    %37 = vector.load %arg5[%36, %c0_19] : memref<64x128xf32, #tpu.memory_space<vmem>>, vector<8x128xf32>
    %38 = arith.truncf %33 : vector<8x128xf32> to vector<8x128xbf16>
    %cst_20 = arith.constant dense<0.000000e+00> : vector<8x128xf32>
    %39 = tpu.matmul %38, %8, %cst_20 {dimension_numbers = #tpu.dot_dimension_numbers<[1], [0], [0], [1], [0, 0, 1, 1], [], []>} : vector<8x128xbf16>, vector<128x128xbf16>, vector<8x128xf32> -> vector<8x128xf32>
    %40 = arith.addf %37, %39 : vector<8x128xf32>
    %41 = math.tanh %40 : vector<8x128xf32>
    %c4_i32 = arith.constant 4 : i32
    %c8_i32_21 = arith.constant 8 : i32
    %42 = arith.muli %c4_i32, %c8_i32_21 : i32
    %43 = tpu.assume_multiple %42, 8 : i32
    %44 = arith.index_cast %43 : i32 to index
    %c0_22 = arith.constant 0 : index
    %45 = vector.load %arg5[%44, %c0_22] : memref<64x128xf32, #tpu.memory_space<vmem>>, vector<8x128xf32>
    %46 = arith.truncf %41 : vector<8x128xf32> to vector<8x128xbf16>
    %cst_23 = arith.constant dense<0.000000e+00> : vector<8x128xf32>
    %47 = tpu.matmul %46, %8, %cst_23 {dimension_numbers = #tpu.dot_dimension_numbers<[1], [0], [0], [1], [0, 0, 1, 1], [], []>} : vector<8x128xbf16>, vector<128x128xbf16>, vector<8x128xf32> -> vector<8x128xf32>
    %48 = arith.addf %45, %47 : vector<8x128xf32>
    %49 = math.tanh %48 : vector<8x128xf32>
    %c5_i32 = arith.constant 5 : i32
    %c8_i32_24 = arith.constant 8 : i32
    %50 = arith.muli %c5_i32, %c8_i32_24 : i32
    %51 = tpu.assume_multiple %50, 8 : i32
    %52 = arith.index_cast %51 : i32 to index
    %c0_25 = arith.constant 0 : index
    %53 = vector.load %arg5[%52, %c0_25] : memref<64x128xf32, #tpu.memory_space<vmem>>, vector<8x128xf32>
    %54 = arith.truncf %49 : vector<8x128xf32> to vector<8x128xbf16>
    %cst_26 = arith.constant dense<0.000000e+00> : vector<8x128xf32>
    %55 = tpu.matmul %54, %8, %cst_26 {dimension_numbers = #tpu.dot_dimension_numbers<[1], [0], [0], [1], [0, 0, 1, 1], [], []>} : vector<8x128xbf16>, vector<128x128xbf16>, vector<8x128xf32> -> vector<8x128xf32>
    %56 = arith.addf %53, %55 : vector<8x128xf32>
    %57 = math.tanh %56 : vector<8x128xf32>
    %c6_i32 = arith.constant 6 : i32
    %c8_i32_27 = arith.constant 8 : i32
    %58 = arith.muli %c6_i32, %c8_i32_27 : i32
    %59 = tpu.assume_multiple %58, 8 : i32
    %60 = arith.index_cast %59 : i32 to index
    %c0_28 = arith.constant 0 : index
    %61 = vector.load %arg5[%60, %c0_28] : memref<64x128xf32, #tpu.memory_space<vmem>>, vector<8x128xf32>
    %62 = arith.truncf %57 : vector<8x128xf32> to vector<8x128xbf16>
    %cst_29 = arith.constant dense<0.000000e+00> : vector<8x128xf32>
    %63 = tpu.matmul %62, %8, %cst_29 {dimension_numbers = #tpu.dot_dimension_numbers<[1], [0], [0], [1], [0, 0, 1, 1], [], []>} : vector<8x128xbf16>, vector<128x128xbf16>, vector<8x128xf32> -> vector<8x128xf32>
    %64 = arith.addf %61, %63 : vector<8x128xf32>
    %65 = math.tanh %64 : vector<8x128xf32>
    %c7_i32 = arith.constant 7 : i32
    %c8_i32_30 = arith.constant 8 : i32
    %66 = arith.muli %c7_i32, %c8_i32_30 : i32
    %67 = tpu.assume_multiple %66, 8 : i32
    %68 = arith.index_cast %67 : i32 to index
    %c0_31 = arith.constant 0 : index
    %69 = vector.load %arg5[%68, %c0_31] : memref<64x128xf32, #tpu.memory_space<vmem>>, vector<8x128xf32>
    %70 = arith.truncf %65 : vector<8x128xf32> to vector<8x128xbf16>
    %cst_32 = arith.constant dense<0.000000e+00> : vector<8x128xf32>
    %71 = tpu.matmul %70, %8, %cst_32 {dimension_numbers = #tpu.dot_dimension_numbers<[1], [0], [0], [1], [0, 0, 1, 1], [], []>} : vector<8x128xbf16>, vector<128x128xbf16>, vector<8x128xf32> -> vector<8x128xf32>
    %72 = arith.addf %69, %71 : vector<8x128xf32>
    %73 = math.tanh %72 : vector<8x128xf32>
    %c8_i32_33 = arith.constant 8 : i32
    %c0_34 = arith.constant 0 : index
    %c0_35 = arith.constant 0 : index
    %74 = vector.load %arg4[%c0_34, %c0_35] : memref<8x128xf32, #tpu.memory_space<vmem>>, vector<8x128xf32>
    tpu.vector_store %arg4[%c0_34, %c0_35], %73 {strides = array<i32>} : memref<8x128xf32, #tpu.memory_space<vmem>>, vector<8x128xf32>,
    return
  }
}

</mosaic_0001>

<bundles_post_ra>
// kernel: tpu_custom_call.1
= control target key start
LH: loop header
LB: loop body
LE: loop exit
PB: predicated region body
PF: predicated region fallthrough
CT: control target
= control target key end

     0   :  { %9 = vsyncpa [#allocation4], 0  ;;  %s1207_s0 = inlined_call_operand.vmem [shape: f32[64,16], index: 0, kind: input, shape index: {}]   ;;  %s1208_s1 = inlined_call_operand.vmem [shape: f32[16,128], index: 1, kind: input, shape index: {}]   ;;  %s1209_s2 = inlined_call_operand.vmem [shape: f32[1,128], index: 2, kind: input, shape index: {}]   ;;  %s1210_s3 = inlined_call_operand.hbm [shape: f32[128,128], index: 3, kind: input, shape index: {}]   ;;  %s1211_s4 = inlined_call_operand.hbm [shape: f32[8,128], index: 4, kind: output, shape index: {}]  }
   0x1   :  { %10 = vsyncpa [#allocation5], 0  ;;  %s928_s15 = smov [#allocation3]   ;;  %s880_s19 = scalar_lea.hbm %s1210_s3, 2048 }
   0x2   :  { %s22_s16 = sshll.u32 %s928_s15, 4  ;;  %p881_p0 = scmp.ne.s32.totalorder %s1210_s3, %s880_s19  ;;  %s23_s16 = int_to_ptr.vmem [resolvable:$true] %s22_s16 }
   0x3   :  { %p884_p1 = scmp.lt.u32.totalorder %s880_s19, %s1210_s3 }
   0x5   :  { %p886_p2 = pnand %p884_p1, %p881_p0 }
   0x7   :  { %889 = shalt.err (!%p886_p2)
}
   0x8   :  { %s890_s24 = scalar_lea.vmem %s23_s16, 2048  ;;  %p895_p4 = scmp.lt.s32.totalorder %s23_s16, %s23_s16 }
   0x9   :  { %p891_p3 = scmp.ne.s32.totalorder %s23_s16, %s890_s24  ;;  %p896_p5 = scmp.lt.s32.totalorder %s890_s24, %s890_s24 }
   0xb   :  { %p897_p6 = por %p896_p5, %p895_p4 }
   0xd   :  { %p898_p7 = pnand %p897_p6, %p891_p3 }
   0xf   :  { %901 = shalt.err (!%p898_p7)
}
  0x10   :  { %s929_s25 = smov 128   ;;  %s930_s26 = smov 8  }
  0x11   :  { %28 = dma.hbm_to_vmem [thread:$0]  %s1210_s3, 2048, %s23_s16, [#allocation4], %s929_s25, %s929_s25, %s930_s26  }
  0x12   :  { %924 = dma.done.wait [#allocation4], 2048  }
  0x13   :  { %925 = vsyncadd [#allocation4], 4294965248  ;;  %v931_v0 = vmov 0.0   ;;  %vm932_vm0 = vmmov 0   ;;  %v188_v1 = vld [vmem:[#allocation3] sm:$0xff]  ;;  %v189_v2 = vld [vmem:[#allocation3 + $0x8] sm:$0xff] }
  0x14   :  { %693 = vmatprep.subr.bf16.mxu1 %v931_v0  ;;  %709 = vmatprep.mubr.msk.bf16.mxu1 %vm932_vm0, %v931_v0  ;;  %v190_v3 = vld [vmem:[#allocation3 + $0x10] sm:$0xff]  ;;  %v975_v4 = vpack.c.bf16 %v189_v2, %v188_v1  ;;  %v191_v5 = vld [vmem:[#allocation3 + $0x18] sm:$0xff]  ;;  %v192_v7 = vld [vmem:[#allocation3 + $0x20] sm:$0xff]  ;;  %vm50_vm1 = vcmask 130048   ;;  %v933_v30 = vmov 0  }
  0x15   :  { %v978_v6 = vpack.c.bf16 %v191_v5, %v190_v3  ;;  %v193_v8 = vld [vmem:[#allocation3 + $0x28] sm:$0xff]  ;;  %v41_v9 = vld [vmem:[%s1208_s1] sm:$0xff]  ;;  %v194_v14 = vld [vmem:[#allocation3 + $0x30] sm:$0xff] }
  0x16   :  { %694 = vmatpush3.bf16.msra.mxu1 %v975_v4  ;;  %v42_v10 = vld [vmem:[%s1208_s1 + $0x8] sm:$0xff]  ;;  %v33_v12 = vld [vmem:[%s1207_s0] sm:$0xff]  ;;  %v992_v13 = vpack.c.bf16 %v193_v8, %v192_v7  ;;  %v195_v15 = vld [vmem:[#allocation3 + $0x38] sm:$0xff] }
  0x17   :  { %695 = vmatprep.subr.bf16.mxu1 %v931_v0  ;;  %v853_v11 = vpack.c.bf16 %v42_v10, %v41_v9  ;;  %681 = vmatprep.mubr.msk.f32.mxu0 %vm50_vm1, %v33_v12  ;;  %v34_v16 = vld [vmem:[%s1207_s0 + $0x8] sm:$0xff]  ;;  %v1000_v17 = vpack.c.bf16 %v195_v15, %v194_v14  ;;  %v196_v18 = vld [vmem:[#allocation3 + $0x40] sm:$0xff]  ;;  %v198_v21 = vld [vmem:[#allocation3 + $0x50] sm:$0xff] }
  0x18   :  { %v197_v19 = vld [vmem:[#allocation3 + $0x48] sm:$0xff]  ;;  %v199_v22 = vld [vmem:[#allocation3 + $0x58] sm:$0xff]  ;;  %v200_v24 = vld [vmem:[#allocation3 + $0x60] sm:$0xff] }
  0x19   :  { %854 = vmatprep.subr.bf16.mxu0 %v853_v11  ;;  %v1007_v20 = vpack.c.bf16 %v197_v19, %v196_v18  ;;  %v1013_v23 = vpack.c.bf16 %v199_v22, %v198_v21  ;;  %v201_v25 = vld [vmem:[#allocation3 + $0x68] sm:$0xff]  ;;  %v202_v27 = vld [vmem:[#allocation3 + $0x70] sm:$0xff]  ;;  %v203_v28 = vld [vmem:[#allocation3 + $0x78] sm:$0xff] }
  0x1a   :  { %696 = vmatpush3.bf16.msra.mxu1 %v978_v6  ;;  %856 = vmatpush3.bf16.msra.mxu0 %v853_v11  ;;  %v1019_v26 = vpack.c.bf16 %v201_v25, %v200_v24  ;;  %v1025_v29 = vpack.c.bf16 %v203_v28, %v202_v27  ;;  %v35_v31 = vld [vmem:[%s1207_s0 + $0x10] sm:$0xff]  ;;  %v36_v32 = vld [vmem:[%s1207_s0 + $0x18] sm:$0xff]  ;;  %v37_v33 = vld [vmem:[%s1207_s0 + $0x20] sm:$0xff] }
  0x1b   :  { %697 = vmatprep.subr.bf16.mxu1 %v931_v0  ;;  %713 = vmatprep.subr.bf16.mxu0 %v931_v0  ;;  %v38_v34 = vld [vmem:[%s1207_s0 + $0x28] sm:$0xff]  ;;  %v39_v35 = vld [vmem:[%s1207_s0 + $0x30] sm:$0xff]  ;;  %v40_v36 = vld [vmem:[%s1207_s0 + $0x38] sm:$0xff]  ;;  %s934_s0 = smov [#allocation6]  }
  0x1c   :  { %v1085_v39 = vld [vmem:[%s1209_s2] ss:$0 sm:$0xff]  ;;  %s577_s2 = sshll.u32 %s934_s0, 4  ;;  %s578_s2 = int_to_ptr.vmem [resolvable:$true] %s577_s2 }
  0x1d   :  { %682 = vmatmul.mubr.msk.f32.vlgmr.msra.gmra.mrb[0].mxu0 %vm50_vm1, %v34_v16  ;;  %s902_s23 = scalar_lea.vmem %s578_s2, 128  ;;  %p907_p9 = scmp.lt.s32.totalorder %s578_s2, %s578_s2 }
  0x1e   :  { %698 = vmatpush3.bf16.msra.mxu1 %v992_v13  ;;  %714 = vmatpush3.bf16.msra.mxu0 %v975_v4  ;;  %p903_p8 = scmp.ne.s32.totalorder %s578_s2, %s902_s23  ;;  %p908_p10 = scmp.lt.s32.totalorder %s902_s23, %s902_s23 }
  0x1f   :  { %699 = vmatprep.subr.bf16.mxu1 %v931_v0  ;;  %715 = vmatprep.subr.bf16.mxu0 %v931_v0 }
  0x20   :  { %684 = vmatprep.mubr.msk.f32.mxu0 %vm50_vm1, %v35_v31  ;;  %p909_p11 = por %p908_p10, %p907_p9 }
  0x21   :  { %685 = vmatmul.mubr.msk.f32.gmra.mrb[2].mxu0 %vm50_vm1, %v36_v32 }
  0x22   :  { %700 = vmatpush3.bf16.msra.mxu1 %v1000_v17  ;;  %716 = vmatpush3.bf16.msra.mxu0 %v978_v6  ;;  %p910_p12 = pnand %p909_p11, %p903_p8 }
  0x23   :  { %701 = vmatprep.subr.bf16.mxu1 %v931_v0  ;;  %717 = vmatprep.subr.bf16.mxu0 %v931_v0 }
  0x24   :  { %687 = vmatprep.mubr.msk.f32.mxu0 %vm50_vm1, %v37_v33 }
  0x25   :  { %688 = vmatmul.mubr.msk.f32.gmra.mrb[4].mxu0 %vm50_vm1, %v38_v34 }
  0x26   :  { %702 = vmatpush3.bf16.msra.mxu1 %v1007_v20  ;;  %718 = vmatpush3.bf16.msra.mxu0 %v992_v13 }
  0x27   :  { %703 = vmatprep.subr.bf16.mxu1 %v931_v0  ;;  %719 = vmatprep.subr.bf16.mxu0 %v931_v0 }
  0x28   :  { %690 = vmatprep.mubr.msk.f32.mxu0 %vm50_vm1, %v39_v35 }
  0x29   :  { %691 = vmatmul.mubr.msk.f32.gmra.mrb[6].mxu0 %vm50_vm1, %v40_v36 }
  0x2a   :  { %704 = vmatpush3.bf16.msra.mxu1 %v1013_v23  ;;  %720 = vmatpush3.bf16.msra.mxu0 %v1000_v17 }
  0x2b   :  { %705 = vmatprep.subr.bf16.mxu1 %v931_v0  ;;  %721 = vmatprep.subr.bf16.mxu0 %v931_v0 }
  0x2c   :  { %729 = vmatprep.mubr.msk.bf16.mxu0 %vm932_vm0, %v931_v0 }
  0x2e   :  { %706 = vmatpush3.bf16.msra.mxu1 %v1019_v26  ;;  %722 = vmatpush3.bf16.msra.mxu0 %v1007_v20 }
  0x2f   :  { %707 = vmatprep.subr.bf16.mxu1 %v931_v0  ;;  %723 = vmatprep.subr.bf16.mxu0 %v931_v0 }
  0x32   :  { %708 = vmatpush3.bf16.msra.mxu1 %v1025_v29  ;;  %724 = vmatpush3.bf16.msra.mxu0 %v1013_v23 }
  0x33   :  { %733 = vmatprep.subr.bf16.mxu1 %v931_v0  ;;  %725 = vmatprep.subr.bf16.mxu0 %v931_v0 }
  0x35   :  { %710 = vmatmul.mubr.bf16.vlgmr.msra.gmra.mrb[0].mxu1 %v933_v30 }
  0x36   :  { %734 = vmatpush3.bf16.msra.mxu1 %v975_v4  ;;  %749 = vmatprep.mubr.msk.bf16.mxu1 %vm932_vm0, %v931_v0 }
  0x37   :  { %726 = vmatpush3.bf16.msra.mxu0 %v1019_v26  ;;  %735 = vmatprep.subr.bf16.mxu1 %v931_v0 }
  0x38   :  { %727 = vmatprep.subr.bf16.mxu0 %v931_v0 }
  0x3a   :  { %736 = vmatpush3.bf16.msra.mxu1 %v978_v6 }
  0x3b   :  { %728 = vmatpush3.bf16.msra.mxu0 %v1025_v29  ;;  %737 = vmatprep.subr.bf16.mxu1 %v931_v0 }
  0x3c   :  { %753 = vmatprep.subr.bf16.mxu0 %v931_v0 }
  0x3e   :  { %738 = vmatpush3.bf16.msra.mxu1 %v992_v13 }
  0x3f   :  { %739 = vmatprep.subr.bf16.mxu1 %v931_v0 }
  0x42   :  { %740 = vmatpush3.bf16.msra.mxu1 %v1000_v17 }
  0x43   :  { %741 = vmatprep.subr.bf16.mxu1 %v931_v0 }
  0x46   :  { %742 = vmatpush3.bf16.msra.mxu1 %v1007_v20 }
  0x47   :  { %743 = vmatprep.subr.bf16.mxu1 %v931_v0 }
  0x4a   :  { %744 = vmatpush3.bf16.msra.mxu1 %v1013_v23 }
  0x4b   :  { %745 = vmatprep.subr.bf16.mxu1 %v931_v0 }
  0x4e   :  { %746 = vmatpush3.bf16.msra.mxu1 %v1019_v26 }
  0x4f   :  { %747 = vmatprep.subr.bf16.mxu1 %v931_v0 }
  0x52   :  { %748 = vmatpush3.bf16.msra.mxu1 %v1025_v29 }
  0x53   :  { %773 = vmatprep.subr.bf16.mxu1 %v931_v0 }
  0xf0   :  { %v683_v37 = vpop.f32.mrb[0].mxu0 }
  0xf1   :  { %v141_v38 = vpop.f32.mrb[1].mxu0  ;;  %v147_v54 = vadd.f32 %v683_v37, %v1085_v39 }
  0xf2   :  { %v142_v40 = vadd.f32 %v1085_v39, %v141_v38 }
  0xf4   :  { %v686_v48 = vpop.f32.mrb[2].mxu0 }
  0xf5   :  { %v151_v49 = vpop.f32.mrb[3].mxu0  ;;  %v157_v9 = vadd.f32 %v686_v48, %v1085_v39 }
  0xf6   :  { %v152_v62 = vadd.f32 %v1085_v39, %v151_v49 }
  0xf8   :  { %v1106_v50 = vpop.f32.mrb[4].mxu0 }
  0xf9   :  { %v1108_v51 = vpop.f32.mrb[5].mxu0 }
  0xfa   :  { %v162_v19 = vadd.f32 %v1085_v39, %v1108_v51 }
  0xfc   :  { %v1110_v52 = vpop.f32.mrb[6].mxu0 }
  0xfd   :  { %v1112_v53 = vpop.f32.mrb[7].mxu0  ;;  %v177_v38 = vadd.f32 %v1110_v52, %v1085_v39 }
 0x108   :  { %v247_v41 = vpop.f32.mrb[0].mxu1 }
 0x109   :  { %v253_v42 = vadd.f32 %v247_v41, %v142_v40  ;;  %v711_v43 = vpop.f32.mrb[1].mxu1 }
 0x10a   :  { %v250_v44 = vpop.f32.mrb[2].mxu1 }
 0x10b   :  { %864 = vtanh.f32 %v253_v42  ;;  %v712_v45 = vpop.f32.mrb[3].mxu1 }
 0x115   :  { %v865_v46 = vpop.eup %864 }
 0x116   :  { %v257_v47 = vpack.c.bf16 %v865_v46, %v865_v46 }
 0x118   :  { %730 = vmatmul.mubr.bf16.vlgmr.msra.gmra.mrb[8].mxu0 %v257_v47 }
 0x119   :  { %754 = vmatpush3.bf16.msra.mxu0 %v975_v4  ;;  %769 = vmatprep.mubr.msk.bf16.mxu0 %vm932_vm0, %v931_v0 }
 0x11a   :  { %755 = vmatprep.subr.bf16.mxu0 %v931_v0 }
 0x11d   :  { %756 = vmatpush3.bf16.msra.mxu0 %v978_v6 }
 0x11e   :  { %757 = vmatprep.subr.bf16.mxu0 %v931_v0 }
 0x121   :  { %758 = vmatpush3.bf16.msra.mxu0 %v992_v13 }
 0x122   :  { %759 = vmatprep.subr.bf16.mxu0 %v931_v0 }
 0x125   :  { %760 = vmatpush3.bf16.msra.mxu0 %v1000_v17 }
 0x126   :  { %761 = vmatprep.subr.bf16.mxu0 %v931_v0 }
 0x129   :  { %762 = vmatpush3.bf16.msra.mxu0 %v1007_v20 }
 0x12a   :  { %763 = vmatprep.subr.bf16.mxu0 %v931_v0 }
 0x12d   :  { %764 = vmatpush3.bf16.msra.mxu0 %v1013_v23 }
 0x12e   :  { %765 = vmatprep.subr.bf16.mxu0 %v931_v0 }
 0x131   :  { %766 = vmatpush3.bf16.msra.mxu0 %v1019_v26 }
 0x132   :  { %767 = vmatprep.subr.bf16.mxu0 %v931_v0 }
 0x135   :  { %768 = vmatpush3.bf16.msra.mxu0 %v1025_v29 }
 0x136   :  { %793 = vmatprep.subr.bf16.mxu0 %v931_v0 }
 0x1eb   :  { %v292_v55 = vpop.f32.mrb[8].mxu0 }
 0x1ec   :  { %v298_v56 = vadd.f32 %v292_v55, %v147_v54  ;;  %v731_v57 = vpop.f32.mrb[9].mxu0 }
 0x1ed   :  { %v295_v58 = vpop.f32.mrb[10].mxu0 }
 0x1ee   :  { %866 = vtanh.f32 %v298_v56  ;;  %v732_v59 = vpop.f32.mrb[11].mxu0 }
 0x1f8   :  { %v867_v60 = vpop.eup %866 }
 0x1f9   :  { %v302_v61 = vpack.c.bf16 %v867_v60, %v867_v60 }
 0x1fb   :  { %750 = vmatmul.mubr.bf16.vlgmr.msra.gmra.mrb[4].mxu1 %v302_v61 }
 0x1fc   :  { %774 = vmatpush3.bf16.msra.mxu1 %v975_v4  ;;  %789 = vmatprep.mubr.msk.bf16.mxu1 %vm932_vm0, %v931_v0 }
 0x1fd   :  { %775 = vmatprep.subr.bf16.mxu1 %v931_v0 }
 0x200   :  { %776 = vmatpush3.bf16.msra.mxu1 %v978_v6 }
 0x201   :  { %777 = vmatprep.subr.bf16.mxu1 %v931_v0 }
 0x204   :  { %778 = vmatpush3.bf16.msra.mxu1 %v992_v13 }
 0x205   :  { %779 = vmatprep.subr.bf16.mxu1 %v931_v0 }
 0x208   :  { %780 = vmatpush3.bf16.msra.mxu1 %v1000_v17 }
 0x209   :  { %781 = vmatprep.subr.bf16.mxu1 %v931_v0 }
 0x20c   :  { %782 = vmatpush3.bf16.msra.mxu1 %v1007_v20 }
 0x20d   :  { %783 = vmatprep.subr.bf16.mxu1 %v931_v0 }
 0x210   :  { %784 = vmatpush3.bf16.msra.mxu1 %v1013_v23 }
 0x211   :  { %785 = vmatprep.subr.bf16.mxu1 %v931_v0 }
 0x214   :  { %786 = vmatpush3.bf16.msra.mxu1 %v1019_v26 }
 0x215   :  { %787 = vmatprep.subr.bf16.mxu1 %v931_v0 }
 0x218   :  { %788 = vmatpush3.bf16.msra.mxu1 %v1025_v29 }
 0x219   :  { %813 = vmatprep.subr.bf16.mxu1 %v931_v0 }
 0x2ce   :  { %v337_v63 = vpop.f32.mrb[4].mxu1 }
 0x2cf   :  { %v343_v1 = vadd.f32 %v337_v63, %v152_v62  ;;  %v751_v2 = vpop.f32.mrb[5].mxu1 }
 0x2d0   :  { %v340_v3 = vpop.f32.mrb[6].mxu1 }
 0x2d1   :  { %868 = vtanh.f32 %v343_v1  ;;  %v752_v5 = vpop.f32.mrb[7].mxu1 }
 0x2db   :  { %v869_v7 = vpop.eup %868 }
 0x2dc   :  { %v347_v8 = vpack.c.bf16 %v869_v7, %v869_v7 }
 0x2de   :  { %770 = vmatmul.mubr.bf16.vlgmr.msra.gmra.mrb[12].mxu0 %v347_v8 }
 0x2df   :  { %794 = vmatpush3.bf16.msra.mxu0 %v975_v4  ;;  %809 = vmatprep.mubr.msk.bf16.mxu0 %vm932_vm0, %v931_v0 }
 0x2e0   :  { %795 = vmatprep.subr.bf16.mxu0 %v931_v0 }
 0x2e3   :  { %796 = vmatpush3.bf16.msra.mxu0 %v978_v6 }
 0x2e4   :  { %797 = vmatprep.subr.bf16.mxu0 %v931_v0 }
 0x2e7   :  { %798 = vmatpush3.bf16.msra.mxu0 %v992_v13 }
 0x2e8   :  { %799 = vmatprep.subr.bf16.mxu0 %v931_v0 }
 0x2eb   :  { %800 = vmatpush3.bf16.msra.mxu0 %v1000_v17 }
 0x2ec   :  { %801 = vmatprep.subr.bf16.mxu0 %v931_v0 }
 0x2ef   :  { %802 = vmatpush3.bf16.msra.mxu0 %v1007_v20 }
 0x2f0   :  { %803 = vmatprep.subr.bf16.mxu0 %v931_v0 }
 0x2f3   :  { %804 = vmatpush3.bf16.msra.mxu0 %v1013_v23 }
 0x2f4   :  { %805 = vmatprep.subr.bf16.mxu0 %v931_v0 }
 0x2f7   :  { %806 = vmatpush3.bf16.msra.mxu0 %v1019_v26 }
 0x2f8   :  { %807 = vmatprep.subr.bf16.mxu0 %v931_v0 }
 0x2fb   :  { %808 = vmatpush3.bf16.msra.mxu0 %v1025_v29 }
 0x2fc   :  { %833 = vmatprep.subr.bf16.mxu0 %v931_v0 }
 0x3b1   :  { %v382_v10 = vpop.f32.mrb[12].mxu0 }
 0x3b2   :  { %v388_v11 = vadd.f32 %v382_v10, %v157_v9  ;;  %v771_v12 = vpop.f32.mrb[13].mxu0 }
 0x3b3   :  { %v385_v14 = vpop.f32.mrb[14].mxu0 }
 0x3b4   :  { %870 = vtanh.f32 %v388_v11  ;;  %v772_v15 = vpop.f32.mrb[15].mxu0 }
 0x3be   :  { %v871_v16 = vpop.eup %870 }
 0x3bf   :  { %v392_v18 = vpack.c.bf16 %v871_v16, %v871_v16 }
 0x3c1   :  { %790 = vmatmul.mubr.bf16.vlgmr.msra.gmra.mrb[8].mxu1 %v392_v18 }
 0x3c2   :  { %814 = vmatpush3.bf16.msra.mxu1 %v975_v4  ;;  %829 = vmatprep.mubr.msk.bf16.mxu1 %vm932_vm0, %v931_v0 }
 0x3c3   :  { %815 = vmatprep.subr.bf16.mxu1 %v931_v0 }
 0x3c6   :  { %816 = vmatpush3.bf16.msra.mxu1 %v978_v6 }
 0x3c7   :  { %817 = vmatprep.subr.bf16.mxu1 %v931_v0 }
 0x3ca   :  { %818 = vmatpush3.bf16.msra.mxu1 %v992_v13 }
 0x3cb   :  { %819 = vmatprep.subr.bf16.mxu1 %v931_v0 }
 0x3ce   :  { %820 = vmatpush3.bf16.msra.mxu1 %v1000_v17 }
 0x3cf   :  { %821 = vmatprep.subr.bf16.mxu1 %v931_v0 }
 0x3d2   :  { %822 = vmatpush3.bf16.msra.mxu1 %v1007_v20 }
 0x3d3   :  { %823 = vmatprep.subr.bf16.mxu1 %v931_v0 }
 0x3d6   :  { %824 = vmatpush3.bf16.msra.mxu1 %v1013_v23 }
 0x3d7   :  { %825 = vmatprep.subr.bf16.mxu1 %v931_v0 }
 0x3da   :  { %826 = vmatpush3.bf16.msra.mxu1 %v1019_v26 }
 0x3db   :  { %827 = vmatprep.subr.bf16.mxu1 %v931_v0 }
 0x3de   :  { %828 = vmatpush3.bf16.msra.mxu1 %v1025_v29 }
 0x494   :  { %v427_v21 = vpop.f32.mrb[8].mxu1 }
 0x495   :  { %v433_v22 = vadd.f32 %v427_v21, %v162_v19  ;;  %v791_v24 = vpop.f32.mrb[9].mxu1 }
 0x496   :  { %v430_v25 = vpop.f32.mrb[10].mxu1 }
 0x497   :  { %872 = vtanh.f32 %v433_v22  ;;  %v792_v27 = vpop.f32.mrb[11].mxu1 }
 0x4a1   :  { %v873_v28 = vpop.eup %872 }
 0x4a2   :  { %v437_v30 = vpack.c.bf16 %v873_v28, %v873_v28 }
 0x4a4   :  { %810 = vmatmul.mubr.bf16.vlgmr.msra.gmra.mrb[16].mxu0 %v437_v30 }
 0x4a5   :  { %834 = vmatpush3.bf16.msra.mxu0 %v975_v4  ;;  %849 = vmatprep.mubr.msk.bf16.mxu0 %vm932_vm0, %v931_v0  ;;  %v167_v4 = vadd.f32 %v1106_v50, %v1085_v39 }
 0x4a6   :  { %835 = vmatprep.subr.bf16.mxu0 %v931_v0 }
 0x4a9   :  { %836 = vmatpush3.bf16.msra.mxu0 %v978_v6 }
 0x4aa   :  { %837 = vmatprep.subr.bf16.mxu0 %v931_v0 }
 0x4ad   :  { %838 = vmatpush3.bf16.msra.mxu0 %v992_v13 }
 0x4ae   :  { %839 = vmatprep.subr.bf16.mxu0 %v931_v0 }
 0x4b1   :  { %840 = vmatpush3.bf16.msra.mxu0 %v1000_v17 }
 0x4b2   :  { %841 = vmatprep.subr.bf16.mxu0 %v931_v0 }
 0x4b5   :  { %842 = vmatpush3.bf16.msra.mxu0 %v1007_v20 }
 0x4b6   :  { %843 = vmatprep.subr.bf16.mxu0 %v931_v0 }
 0x4b9   :  { %844 = vmatpush3.bf16.msra.mxu0 %v1013_v23  ;;  %v172_v23 = vadd.f32 %v1085_v39, %v1112_v53 }
 0x4ba   :  { %845 = vmatprep.subr.bf16.mxu0 %v931_v0 }
 0x4bd   :  { %846 = vmatpush3.bf16.msra.mxu0 %v1019_v26 }
 0x4be   :  { %847 = vmatprep.subr.bf16.mxu0 %v931_v0 }
 0x4c1   :  { %848 = vmatpush3.bf16.msra.mxu0 %v1025_v29 }
 0x577   :  { %v472_v6 = vpop.f32.mrb[16].mxu0 }
 0x578   :  { %v478_v13 = vadd.f32 %v472_v6, %v167_v4  ;;  %v811_v17 = vpop.f32.mrb[17].mxu0 }
 0x579   :  { %v475_v31 = vpop.f32.mrb[18].mxu0 }
 0x57a   :  { %874 = vtanh.f32 %v478_v13  ;;  %v812_v20 = vpop.f32.mrb[19].mxu0 }
 0x584   :  { %v875_v32 = vpop.eup %874 }
 0x585   :  { %v482_v33 = vpack.c.bf16 %v875_v32, %v875_v32 }
 0x587   :  { %830 = vmatmul.mubr.bf16.vlgmr.msra.gmra.mrb[12].mxu1 %v482_v33 }
 0x65a   :  { %v517_v26 = vpop.f32.mrb[12].mxu1 }
 0x65b   :  { %v523_v34 = vadd.f32 %v517_v26, %v172_v23  ;;  %v831_v0 = vpop.f32.mrb[13].mxu1 }
 0x65c   :  { %v520_v35 = vpop.f32.mrb[14].mxu1 }
 0x65d   :  { %876 = vtanh.f32 %v523_v34  ;;  %v832_v29 = vpop.f32.mrb[15].mxu1 }
 0x667   :  { %v877_v36 = vpop.eup %876 }
 0x668   :  { %v527_v37 = vpack.c.bf16 %v877_v36, %v877_v36 }
 0x66a   :  { %850 = vmatmul.mubr.bf16.vlgmr.msra.gmra.mrb[20].mxu0 %v527_v37 }
 0x73d   :  { %v562_v40 = vpop.f32.mrb[20].mxu0 }
 0x73e   :  { %v568_v41 = vadd.f32 %v562_v40, %v177_v38  ;;  %v851_v42 = vpop.f32.mrb[21].mxu0 }
 0x73f   :  { %v565_v43 = vpop.f32.mrb[22].mxu0 }
 0x740   :  { %878 = vtanh.f32 %v568_v41  ;;  %v852_v44 = vpop.f32.mrb[23].mxu0 }
 0x74a   :  { %v879_v45 = vpop.eup %878 }
 0x74b   :  { %570 = vst [vmem:[#allocation6] sm:$0xff] %v879_v45 }
 0x74c   :  { %913 = shalt.err (!%p910_p12)
}
 0x74d   :  { %s914_s26 = scalar_lea.hbm %s1211_s4, 128 }
 0x74e   :  { %p915_p13 = scmp.ne.s32.totalorder %s1211_s4, %s914_s26  ;;  %p918_p0 = scmp.lt.u32.totalorder %s914_s26, %s1211_s4 }
 0x750   :  { %p920_p1 = pnand %p918_p0, %p915_p13 }
 0x752   :  { %923 = shalt.err (!%p920_p1)
}
 0x753   :  { %580 = dma.vmem_to_hbm [thread:$0]  %s578_s2, 128, %s1211_s4, [#allocation5]  }
 0x754   :  { %926 = dma.done.wait [#allocation5], 128  }
 0x755   :  { %927 = vsyncadd [#allocation5], 4294967168 }
 0x756   :  { %584 = vsyncpa [#allocation4], 1 }
 0x757   :  { %585 = vsyncpa [#allocation5], 1 }

</bundles_post_ra>
